<compile_context>
chip_gen: v6e
topology: v6e:2x2x1
jax: 0.10.0
libtpu: 0.0.40
codegen_flags: <defaults>
</compile_context>

<pallas_src>
import functools
import math

import jax
import jax.numpy as jnp
from jax import lax
from jax.experimental import pallas as pl
from jax.experimental.pallas import tpu as pltpu


def _round_up(x, m):
    return ((x + m - 1) // m) * m


def _round_down(x, m):
    return (x // m) * m


def safe_layer_norm_kernel(x_ref, w_ref, b_ref, o_ref, *, eps, count):
    x = x_ref[...]
    inv_count = 1.0 / count

    # One-pass moments, accumulated in f32 (XLU reductions; no MXU work).
    xf = x.astype(jnp.float32)
    mean = jnp.sum(xf, axis=-1, keepdims=True) * inv_count
    sumsq = jnp.sum(xf * xf, axis=-1, keepdims=True) * inv_count
    # sumsq - mean^2 is cancellation-prone -> clamp at 0 so rsqrt never sees
    # a (tiny) negative value.  This is the "Safe" in SafeLayerNorm.
    var = jnp.maximum(sumsq - mean * mean, 0.0)
    inv_std = lax.rsqrt(var + eps)          # EUP slot — effectively free.

    if x.dtype == jnp.float32:
        y = (xf - mean) * inv_std * w_ref[...] + b_ref[...]
    else:
        # bf16/f16 path: keep the full-width center/scale/shift in the input
        # dtype (bf16 VALUs on v6e/v7x); only the per-row scalars are cast.
        y = ((x - mean.astype(x.dtype)) * inv_std.astype(x.dtype)
             * w_ref[...] + b_ref[...])
    o_ref[...] = y.astype(o_ref.dtype)


def safe_layer_norm(x, weight, bias, *, eps=1e-5, row_tile=None,
                    target_block_bytes=4 << 20):
    orig_shape = x.shape
    d = orig_shape[-1]
    rows = math.prod(orig_shape[:-1]) if len(orig_shape) > 1 else 1
    x2 = x.reshape(rows, d)
    w2 = weight.reshape(1, d).astype(x.dtype)
    b2 = bias.reshape(1, d).astype(x.dtype)
    itemsize = x.dtype.itemsize

    if row_tile is None:
        # Byte-budget tile: >= ~1 MiB to sit on the HBM roofline, small
        # enough that double-buffered in/out blocks + f32 intermediates stay
        # well inside v7x's 64 MiB VMEM (and v5e's raised scoped limit).
        row_tile = max(8, _round_down(target_block_bytes // (d * itemsize), 8))
    row_tile = max(8, _round_up(row_tile, 8))
    row_tile = min(row_tile, _round_up(rows, 8))

    # v7x has 2 TensorCores/chip: keep >= 2 grid steps when there is enough
    # work so the "parallel" row axis can be sharded across cores.
    if rows >= 16 and pl.cdiv(rows, row_tile) < 2:
        row_tile = max(8, _round_up(pl.cdiv(rows, 2), 8))

    grid = (pl.cdiv(rows, row_tile),)

    # Explicit scoped-VMEM budget: double-buffered x + out blocks, plus
    # headroom for the full-width f32 intermediates inside the kernel body.
    block_bytes = row_tile * d * itemsize
    interm_bytes = 3 * row_tile * d * 4
    vmem_bytes = 4 * block_bytes + interm_bytes + 4 * d * itemsize
    vmem_limit = int(min(max(int(vmem_bytes * 1.25), 16 << 20), 56 << 20))

    kernel = functools.partial(safe_layer_norm_kernel,
                               eps=float(eps), count=float(d))

    out = pl.pallas_call(
        kernel,
        out_shape=jax.ShapeDtypeStruct((rows, d), x.dtype),
        grid_spec=pltpu.PrefetchScalarGridSpec(
            num_scalar_prefetch=0,
            grid=grid,
            in_specs=[
                pl.BlockSpec((row_tile, d), lambda i: (i, 0)),   # x rows
                pl.BlockSpec((1, d), lambda i: (0, 0)),          # weight
                pl.BlockSpec((1, d), lambda i: (0, 0)),          # bias
            ],
            out_specs=pl.BlockSpec((row_tile, d), lambda i: (i, 0)),
        ),
        compiler_params=pltpu.CompilerParams(
            dimension_semantics=("parallel",),
            vmem_limit_bytes=vmem_limit),
    )(x2, w2, b2)

    return out.reshape(orig_shape)


def reference_forward(x, weight, bias, *, eps=1e-5):
    """Plain-JAX replica of the PyTorch SafeLayerNorm.forward."""
    count = x.shape[-1]
    mean = jnp.sum(x, axis=-1, keepdims=True) / count
    var = jnp.sum((x - mean) ** 2, axis=-1, keepdims=True) / count
    return (x - mean) / jnp.sqrt(var + eps) * weight + bias


if __name__ == "__main__":
    key = jax.random.PRNGKey(0)
    kx, kw, kb, kx2 = jax.random.split(key, 4)

    # Test 1: module-consistent small shape (batch=2, seq=16, hidden=256).
    B, S, D = 2, 16, 256
    x = jax.random.normal(kx, (B, S, D), jnp.float32)
    weight = 1.0 + 0.1 * jax.random.normal(kw, (D,), jnp.float32)
    bias = 0.1 * jax.random.normal(kb, (D,), jnp.float32)

    ref = reference_forward(x, weight, bias, eps=1e-5)
    out = jax.block_until_ready(safe_layer_norm(x, weight, bias))
    assert out.shape == x.shape
    assert jnp.max(jnp.abs(out - ref)) < 1e-4, "mismatch vs. reference"

    # Explicit small tile -> 4-step grid over 8-row tiles.
    out_tiled = jax.block_until_ready(
        safe_layer_norm(x, weight, bias, row_tile=8))
    assert jnp.max(jnp.abs(out_tiled - ref)) < 1e-4, "tiled mismatch"

    # Test 2: rows (2*13=26) not a multiple of the row tile -> exercises the
    # no-pad partial edge block path.
    D2 = 384
    x_odd = jax.random.normal(kx2, (2, 13, D2), jnp.float32)
    w_odd = 1.0 + 0.1 * jax.random.normal(kw, (D2,), jnp.float32)
    b_odd = 0.1 * jax.random.normal(kb, (D2,), jnp.float32)
    ref_odd = reference_forward(x_odd, w_odd, b_odd, eps=1e-5)
    out_odd = jax.block_until_ready(safe_layer_norm(x_odd, w_odd, b_odd))
    assert out_odd.shape == x_odd.shape
    assert jnp.max(jnp.abs(out_odd - ref_odd)) < 1e-4, "partial-block mismatch"

    # Test 3: bf16 input path (f32 reduction accumulation, bf16 elementwise).
    x_bf = x[:, :8, :128].astype(jnp.bfloat16)
    w_bf = weight[:128].astype(jnp.bfloat16)
    b_bf = bias[:128].astype(jnp.bfloat16)
    ref_bf = reference_forward(x_bf.astype(jnp.float32),
                               w_bf.astype(jnp.float32),
                               b_bf.astype(jnp.float32), eps=1e-5)
    out_bf = jax.block_until_ready(safe_layer_norm(x_bf, w_bf, b_bf))
    assert out_bf.shape == x_bf.shape
    assert jnp.max(jnp.abs(out_bf.astype(jnp.float32) - ref_bf)) < 6e-2, \
        "bf16 mismatch"

    print("KERNEL_OK")
</pallas_src>

<mosaic_0001>
module attributes {stable_mosaic.version = 11 : i64} {
  func.func @safe_layer_norm_kernel(%arg0: i32, %arg1: memref<16x256xf32, #tpu.memory_space<vmem>>, %arg2: memref<1x256xf32, #tpu.memory_space<vmem>>, %arg3: memref<1x256xf32, #tpu.memory_space<vmem>>, %arg4: memref<16x256xf32, #tpu.memory_space<vmem>>) attributes {dimension_semantics = [#tpu.dimension_semantics<parallel>], iteration_bounds = array<i64: 2>, scalar_prefetch = 0 : i64, scratch_operands = 0 : i64, tpu.core_type = #tpu.core_type<tc>, window_params = [{transform_indices = @transform_0, window_bounds = array<i64: 16, 256>}, {pipeline_mode = #tpu.pipeline_mode<synchronous>, transform_indices = @transform_1, window_bounds = array<i64: 1, 256>}, {pipeline_mode = #tpu.pipeline_mode<synchronous>, transform_indices = @transform_2, window_bounds = array<i64: 1, 256>}, {transform_indices = @transform_3, window_bounds = array<i64: 16, 256>}]} {
    %c0 = arith.constant 0 : index
    %c0_0 = arith.constant 0 : index
    %0 = vector.load %arg1[%c0, %c0_0] : memref<16x256xf32, #tpu.memory_space<vmem>>, vector<16x256xf32>
    %cst = arith.constant dense<0.000000e+00> : vector<16xf32>
    %1 = vector.multi_reduction <add>, %0, %cst [1] : vector<16x256xf32> to vector<16xf32>
    %2 = vector.shape_cast %1 : vector<16xf32> to vector<16x1xf32>
    %cst_1 = arith.constant 3.906250e-03 : f32
    %3 = vector.broadcast %cst_1 : f32 to vector<16x1xf32>
    %4 = arith.mulf %2, %3 : vector<16x1xf32>
    %5 = arith.mulf %0, %0 : vector<16x256xf32>
    %cst_2 = arith.constant dense<0.000000e+00> : vector<16xf32>
    %6 = vector.multi_reduction <add>, %5, %cst_2 [1] : vector<16x256xf32> to vector<16xf32>
    %7 = vector.shape_cast %6 : vector<16xf32> to vector<16x1xf32>
    %cst_3 = arith.constant 3.906250e-03 : f32
    %8 = vector.broadcast %cst_3 : f32 to vector<16x1xf32>
    %9 = arith.mulf %7, %8 : vector<16x1xf32>
    %10 = arith.mulf %4, %4 : vector<16x1xf32>
    %11 = arith.subf %9, %10 : vector<16x1xf32>
    %cst_4 = arith.constant 0.000000e+00 : f32
    %12 = vector.broadcast %cst_4 : f32 to vector<16x1xf32>
    %13 = arith.maximumf %11, %12 : vector<16x1xf32>
    %cst_5 = arith.constant 9.99999974E-6 : f32
    %14 = vector.broadcast %cst_5 : f32 to vector<16x1xf32>
    %15 = arith.addf %13, %14 : vector<16x1xf32>
    %16 = math.rsqrt %15 : vector<16x1xf32>
    %17 = vector.broadcast %4 : vector<16x1xf32> to vector<16x256xf32>
    %18 = arith.subf %0, %17 : vector<16x256xf32>
    %19 = vector.broadcast %16 : vector<16x1xf32> to vector<16x256xf32>
    %20 = arith.mulf %18, %19 : vector<16x256xf32>
    %c0_6 = arith.constant 0 : index
    %c0_7 = arith.constant 0 : index
    %21 = vector.load %arg2[%c0_6, %c0_7] : memref<1x256xf32, #tpu.memory_space<vmem>>, vector<1x256xf32>
    %22 = vector.broadcast %21 : vector<1x256xf32> to vector<16x256xf32>
    %23 = arith.mulf %20, %22 : vector<16x256xf32>
    %c0_8 = arith.constant 0 : index
    %c0_9 = arith.constant 0 : index
    %24 = vector.load %arg3[%c0_8, %c0_9] : memref<1x256xf32, #tpu.memory_space<vmem>>, vector<1x256xf32>
    %25 = vector.broadcast %24 : vector<1x256xf32> to vector<16x256xf32>
    %26 = arith.addf %23, %25 : vector<16x256xf32>
    %c0_10 = arith.constant 0 : index
    %c0_11 = arith.constant 0 : index
    %27 = vector.load %arg4[%c0_10, %c0_11] : memref<16x256xf32, #tpu.memory_space<vmem>>, vector<16x256xf32>
    tpu.vector_store %arg4[%c0_10, %c0_11], %26 {strides = array<i32>} : memref<16x256xf32, #tpu.memory_space<vmem>>, vector<16x256xf32>,
    return
  }
  func.func @transform_0(%arg0: i32) -> (i32, i32) {
    %c0_i32 = arith.constant 0 : i32
    %c0_i32_0 = arith.constant 0 : i32
    return %arg0, %c0_i32 : i32, i32
  }
  func.func @transform_1(%arg0: i32) -> (i32, i32) {
    %c0_i32 = arith.constant 0 : i32
    %c0_i32_0 = arith.constant 0 : i32
    %c0_i32_1 = arith.constant 0 : i32
    return %c0_i32, %c0_i32_0 : i32, i32
  }
  func.func @transform_2(%arg0: i32) -> (i32, i32) {
    %c0_i32 = arith.constant 0 : i32
    %c0_i32_0 = arith.constant 0 : i32
    %c0_i32_1 = arith.constant 0 : i32
    return %c0_i32, %c0_i32_0 : i32, i32
  }
  func.func @transform_3(%arg0: i32) -> (i32, i32) {
    %c0_i32 = arith.constant 0 : i32
    %c0_i32_0 = arith.constant 0 : i32
    return %arg0, %c0_i32 : i32, i32
  }
}

</mosaic_0001>

<bundles_post_ra>
// kernel: tpu_custom_call.1
= control target key start
LH: loop header
LB: loop body
LE: loop exit
PB: predicated region body
PF: predicated region fallthrough
CT: control target
= control target key end

     0   :  { %8 = vsyncpa [#allocation3], 0  ;;  %s807_s0 = inlined_call_operand.hbm [shape: f32[32,256], index: 0, kind: input, shape index: {}]   ;;  %s808_s1 = inlined_call_operand.hbm [shape: f32[1,256], index: 1, kind: input, shape index: {}]   ;;  %s809_s2 = inlined_call_operand.vmem [shape: f32[1,256], index: 2, kind: input, shape index: {}]   ;;  %s810_s3 = inlined_call_operand.hbm [shape: f32[32,256], index: 3, kind: output, shape index: {}]  }
   0x1   :  { %10 = vsyncpa [#allocation3 + $0x1], 0 }
   0x2   :  { %11 = vsyncpa [#allocation6], 0 }
   0x3   :  { %12 = vsyncpa [#allocation4], 0 }
   0x4   :  { %14 = vsyncpa [#allocation4 + $0x1], 0  ;;  %s619_s12 = smov 0   ;;  %s621_s13 = smov 0  }
   0x5   :  { %s623_s14 = smov 0   ;;  %s625_s15 = smov 0  }
   0x6 LB: > { %s640_s16 = sadd.s32 4294967295, %s590_s15   ;;  %s381_s17 = sadd.s32 4294967294, %s590_s15   ;;  %s590_s15 = sphi %s625_s15, %s833_s15   ;;  %s586_s14 = sphi %s623_s14, %s832_s14   ;;  %s582_s13 = sphi %s621_s13, %s831_s13   ;;  %s578_s12 = sphi %s619_s12, %s830_s12  }
   0x7   : > { %s644_s18 = sadd.s32 1, %s590_s15   ;;  %s27_s19 = sadd.s32 1, %s586_s14 }
   0x8   : > { %s24_s20 = ssub.s32 %s590_s15, %s644_s18  ;;  %p34_p0 = scmp.ne.s32.totalorder %s586_s14, %s582_s13 }
   0x9   : > { %p25_p1 = scmp.eq.s32.totalorder %s24_s20, 0  ;;  %p35_p2 = scmp.eq.s32.totalorder %s590_s15, 0 }
   0xa   : > { %p40_p3 = scmp.ne.s32.totalorder %s582_s13, %s578_s12  ;;  %p811_p4 = scmp.eq.s32.totalorder %s640_s16, 0 }
   0xb   : > { %s656_s21 = scalar_select %p25_p1, %s586_s14, %s27_s19  }
   0xc   : > { %p658_p5 = por %p35_p2, %p34_p0  ;;  %p664_p6 = por %p811_p4, %p40_p3 }
   0xd   : > { %p106_p7 = scmp.eq.s32.totalorder %s640_s16, 1  ;;  %p112_p8 = scmp.eq.s32.totalorder %s381_s17, 1 }
   0xe   : > { %s816_s23 = scalar_select %p664_p6, 1, 0 }
   0xf   : > { %p382_p9 = scmp.ge.s32.totalorder %s590_s15, 1  ;;  %p119_p10 = scmp.lt.s32.totalorder %s590_s15, 3 }
  0x10   : > { %p671_p11 = por %p106_p7, %p34_p0  ;;  %p675_p12 = por %p112_p8, %p40_p3 }
  0x11   : > { %p679_p13 = pnand %p382_p9, %p119_p10  ;;  %s592_s27 = smov [#allocation5]  }
  0x12   : > { %s817_s24 = scalar_select %p671_p11, 1, 0 }
  0x13   : > { %s818_s25 = scalar_select %p675_p12, 1, 0 }
  0x14   : > { %s819_s26 = scalar_select %p679_p13, 1, 0 }
  0x15   : > { %p411_p2 = pneg %p679_p13  ;;  %s132_s28 = sshll.u32 %s592_s27, 4  ;;  %s133_s28 = int_to_ptr.vmem [resolvable:$true] %s132_s28 }
  0x16   : > { %p424_p4 = scmp.lt.s32.totalorder %s590_s15, 2  ;;  %p820_p0 = scmp.eq.s32.totalorder %s640_s16, 0 }
  0x17   : > { %s146_s30 = sand.u32 1, %s586_s14   ;;  %s479_s6 = scalar_lea.vmem %s133_s28, 32 }
  0x18   : > { %p689_p7 = pnand %p411_p2, %p820_p0  ;;  %p696_p3 = pnand %p424_p4, %p658_p5 }
  0x19   : > { %s385_s5 = sshll.u32 %s146_s30, 5  ;;  %p480_p9 = scmp.ne.s32.totalorder %s133_s28, %s479_s6 }
  0x1a   : > { %p470_p8 = pneg %p689_p7  ;;  %p487_p12 = scmp.lt.s32.totalorder %s133_s28, %s133_s28 }
  0x1b   : > { %p488_p11 = scmp.lt.s32.totalorder %s479_s6, %s479_s6 }
  0x1c   : > { %p482_p10 = pnand %p480_p9, %p470_p8 }
  0x1d   : > { %p489_p2 = por %p488_p11, %p487_p12 }
  0x1e   : > { %p483_p1 = pneg %p482_p10 }
  0x20   : > { %p490_p0 = pnand %p489_p2, %p483_p1 }
  0x22   : > { %493 = shalt.err (!%p490_p0)
}
  0x23   : > { %414 = dma.hbm_to_vmem [thread:$0]  (!%p689_p7), %s808_s1, 32, %s133_s28, [#allocation6]  }
  0x24   : > { %s400_s9 = sshll.u32 %s590_s15, 9  ;;  %s150_s10 = scalar_lea.vmem [#allocation2], %s385_s5 }
  0x25   : > { %s158_s11 = sshll.u32 %s150_s10, 4  ;;  %s711_s20 = scalar_lea.hbm %s807_s0, %s400_s9  ;;  %s713_s11 = int_to_ptr.vmem [resolvable:$true] %s158_s11 }
  0x26   : > { %s715_s22 = scalar_lea.sflag [#allocation3], %s146_s30  ;;  %s494_s27 = scalar_lea.hbm %s711_s20, 512 }
  0x27   : > { %p495_p4 = scmp.ne.s32.totalorder %s711_s20, %s494_s27  ;;  %p496_p5 = pneg %p696_p3 }
  0x28   : > { %s499_s5 = scalar_lea.hbm %s807_s0, 1024  ;;  %p500_p1 = scmp.lt.s32.totalorder %s711_s20, %s807_s0 }
  0x29   : > { %p497_p11 = pnand %p496_p5, %p495_p4  ;;  %p501_p7 = scmp.lt.s32.totalorder %s499_s5, %s494_s27 }
  0x2b   : > { %p498_p12 = pneg %p497_p11  ;;  %p502_p8 = por %p501_p7, %p500_p1 }
  0x2d   : > { %p503_p9 = pnand %p502_p8, %p498_p12 }
  0x2f   : > { %506 = shalt.err (!%p503_p9)
}
  0x30   : > { %s507_s30 = scalar_lea.vmem %s713_s11, 512  ;;  %s593_s8 = smov [#allocation2]  }
  0x31   : > { %p508_p10 = scmp.ne.s32.totalorder %s713_s11, %s507_s30  ;;  %s512_s9 = sshll.u32 %s593_s8, 4  ;;  %s513_s9 = int_to_ptr.vmem [resolvable:$false] %s512_s9 }
  0x32   : > { %s514_s10 = scalar_lea.vmem %s513_s9, 1024  ;;  %p515_p4 = scmp.lt.s32.totalorder %s713_s11, %s513_s9 }
  0x33   : > { %p510_p2 = pnand %p508_p10, %p496_p5  ;;  %p516_p11 = scmp.lt.s32.totalorder %s514_s10, %s507_s30 }
  0x35   : > { %p511_p0 = pneg %p510_p2  ;;  %p517_p6 = por %p516_p11, %p515_p4 }
  0x37   : > { %p518_p13 = pnand %p517_p6, %p511_p0 }
  0x39   : > { %521 = shalt.err (!%p518_p13)
}
  0x3a   : > { %s594_s17 = smov 256   ;;  %s595_s19 = smov 16  }
  0x3b   : > { %418 = dma.hbm_to_vmem [thread:$0]  (!%p696_p3), %s711_s20, 512, %s713_s11, %s715_s22, %s594_s17, %s594_s17, %s595_s19  }
  0x3c   : > { %p823_p5 = scmp.ne.s32.totalorder %s819_s26, 0 }
  0x3d   : > { %s739_s27 = sand.u32 (!%p823_p5), 1, %s582_s13   ;;  %p824_p6 = scmp.ne.s32.totalorder (!%p823_p5), %s816_s23, 0 }
  0x3e   : > { %170 = sbr.rel (%p823_p5) target bundleno = 260 (0x104), region = 32  ;;  %s390_s28 = sshll.u32 (!%p823_p5), %s739_s27, 5 }
  0x3f   : > { %s173_s29 = scalar_lea.sflag (!%p823_p5), [#allocation3], %s739_s27  ;;  %s176_s5 = scalar_lea.vmem (!%p823_p5), [#allocation2], %s390_s28 }
  0x43   : > { %565 = dma.done.wait (%p824_p6), %s173_s29, 512  }
  0x44   : > { %567 = vsyncadd (%p824_p6), %s173_s29, 4294966784  ;;  %p825_p13 = scmp.eq.s32.totalorder %s640_s16, 0 }
  0x46   : > { %569 = dma.done.wait (%p825_p13), [#allocation6], 32   ;;  %p826_p3 = pmov %p825_p13 }
  0x47   : > { %v205_v0 = vld [vmem:[%s176_s5] sm:$0xff]  ;;  %v206_v1 = vld [vmem:[%s176_s5 + $0x8] sm:$0xff]  ;;  %v207_v2 = vld [vmem:[%s176_s5 + $0x10] sm:$0xff]  ;;  %v249_v26 = vlaneseq  ;;  %s402_s4 = sshll.u32 %s640_s16, 9  ;;  %s202_s11 = scalar_lea.vmem [#allocation7], %s390_s28 }
  0x48   : > { %571 = vsyncadd (%p826_p3), [#allocation6], 4294967264  ;;  %v209_v3 = vadd.f32 %v206_v1, %v205_v0  ;;  %v217_v4 = vmul.f32 %v205_v0, %v205_v0  ;;  %v218_v5 = vmul.f32 %v206_v1, %v206_v1  ;;  %v208_v6 = vld [vmem:[%s176_s5 + $0x18] sm:$0xff]  ;;  %v219_v7 = vmul.f32 %v207_v2, %v207_v2  ;;  %v247_v32 = vld [vmem:[#allocation5] sm:$0x3]  ;;  %s298_s20 = sshll.u32 %s202_s11, 4  ;;  %s762_s7 = scalar_lea.hbm %s810_s3, %s402_s4  ;;  %s764_s20 = int_to_ptr.vmem [resolvable:$true] %s298_s20 }
  0x49   : > { %v220_v8 = vmul.f32 %v208_v6, %v208_v6  ;;  %v212_v10 = vadd.f32 %v208_v6, %v207_v2  ;;  %v250_v29 = vshrl.u32 %v249_v26, 7  ;;  %v263_v33 = vld [vmem:[%s809_s2] sm:$0x3]  ;;  %s284_s16 = scalar_lea.sflag [#allocation4], %s739_s27  ;;  %s522_s30 = scalar_lea.vmem %s764_s20, 512 }
  0x4a   : > { %210 = vadd.xlane.f32.xlu0 %v209_v3  ;;  %v221_v9 = vadd.f32 %v218_v5, %v217_v4  ;;  %p523_p12 = scmp.ne.s32.totalorder %s764_s20, %s522_s30  ;;  %p827_p1 = scmp.ne.s32.totalorder %s817_s24, 0 }
  0x4b   : > { %v224_v11 = vadd.f32 %v220_v8, %v219_v7  ;;  %v251_v30 = vsub.s32 0, %v250_v29  ;;  %v255_v31 = vsub.s32 1, %v250_v29  ;;  %s596_s8 = smov [#allocation7]  }
  0x4c   : > { %222 = vadd.xlane.f32.xlu1 %v221_v9  ;;  %p524_p7 = pnand %p523_p12, %p827_p1  ;;  %s526_s9 = sshll.u32 %s596_s8, 4  ;;  %s527_s9 = int_to_ptr.vmem [resolvable:$false] %s526_s9 }
  0x4d   : > { %v252_v36 = vrot.slane %v247_v32, %v251_v30  ;;  %v256_v37 = vrot.slane %v247_v32, %v255_v31  ;;  %v268_v39 = vrot.slane %v263_v33, %v251_v30  ;;  %v272_v40 = vrot.slane %v263_v33, %v255_v31  ;;  %s528_s10 = scalar_lea.vmem %s527_s9, 1024  ;;  %p529_p9 = scmp.lt.s32.totalorder %s764_s20, %s527_s9 }
  0x4e   : > { %213 = vadd.xlane.f32.xlu0 %v212_v10  ;;  %p525_p8 = pneg %p524_p7  ;;  %p530_p10 = scmp.lt.s32.totalorder %s528_s10, %s522_s30 }
  0x50   : > { %225 = vadd.xlane.f32.xlu1 %v224_v11  ;;  %p531_p2 = por %p530_p10, %p529_p9 }
  0x52   : > { %p532_p0 = pnand %p531_p2, %p525_p8 }
  0xd3   : > { %v211_v12 = vpop.xlane.xlu0 %210 }
  0xd4   : > { %v215_v13 = vmul.f32 0.00390625, %v211_v12 }
  0xd5   : > { %v223_v14 = vpop.xlane.xlu1 %222 }
  0xd6   : > { %v227_v15 = vmul.f32 0.00390625, %v223_v14  ;;  %v229_v16 = vmul.f32 %v215_v13, %v215_v13  ;;  %v239_v34 = vsub.f32 %v205_v0, %v215_v13  ;;  %v240_v35 = vsub.f32 %v206_v1, %v215_v13 }
  0xd7   : > { %v214_v17 = vpop.xlane.xlu0 %213 }
  0xd8   : > { %v231_v18 = vsub.f32 %v227_v15, %v229_v16  ;;  %v216_v19 = vmul.f32 0.00390625, %v214_v17 }
  0xd9   : > { %v226_v20 = vpop.xlane.xlu1 %225 }
  0xda   : > { %v233_v21 = vmax.f32 %v231_v18, 0.0  ;;  %v228_v22 = vmul.f32 0.00390625, %v226_v20  ;;  %v230_v23 = vmul.f32 %v216_v19, %v216_v19  ;;  %v241_v45 = vsub.f32 %v207_v2, %v216_v19 }
  0xdb   : > { %v242_v46 = vsub.f32 %v208_v6, %v216_v19 }
  0xdc   : > { %v235_v24 = vadd.f32 1e-05, %v233_v21  ;;  %v232_v25 = vsub.f32 %v228_v22, %v230_v23 }
  0xde   : > { %464 = vrsqrt.f32 %v235_v24  ;;  %v234_v27 = vmax.f32 %v232_v25, 0.0 }
  0xe0   : > { %v236_v28 = vadd.f32 1e-05, %v234_v27 }
  0xe2   : > { %466 = vrsqrt.f32 %v236_v28 }
  0xeb   : > { %v465_v38 = vpop.eup %464 }
  0xec   : > { %v243_v41 = vmul.f32 %v465_v38, %v239_v34  ;;  %v244_v42 = vmul.f32 %v465_v38, %v240_v35 }
  0xee   : > { %v259_v43 = vmul.f32 %v252_v36, %v243_v41  ;;  %v260_v44 = vmul.f32 %v256_v37, %v244_v42 }
  0xef   : > { %v467_v47 = vpop.eup %466 }
  0xf0   : > { %v275_v48 = vadd.f32 %v268_v39, %v259_v43  ;;  %v276_v49 = vadd.f32 %v272_v40, %v260_v44  ;;  %v245_v50 = vmul.f32 %v467_v47, %v241_v45  ;;  %v246_v51 = vmul.f32 %v467_v47, %v242_v46 }
  0xf2   : > { %279 = vst [vmem:[%s202_s11] sm:$0xff] %v275_v48  ;;  %280 = vst [vmem:[%s202_s11 + $0x8] sm:$0xff] %v276_v49  ;;  %v261_v52 = vmul.f32 %v252_v36, %v245_v50  ;;  %v262_v53 = vmul.f32 %v256_v37, %v246_v51 }
  0xf4   : > { %v277_v54 = vadd.f32 %v268_v39, %v261_v52  ;;  %v278_v55 = vadd.f32 %v272_v40, %v262_v53 }
  0xf6   : > { %281 = vst [vmem:[%s202_s11 + $0x10] sm:$0xff] %v277_v54  ;;  %282 = vst [vmem:[%s202_s11 + $0x18] sm:$0xff] %v278_v55 }
  0xf7   : > { %535 = shalt.err (!%p532_p0)
}
  0xf8   : > { %s536_s17 = scalar_lea.hbm %s762_s7, 512  ;;  %s540_s29 = scalar_lea.hbm %s810_s3, 1024 }
  0xf9   : > { %p537_p4 = scmp.ne.s32.totalorder %s762_s7, %s536_s17  ;;  %p541_p6 = scmp.lt.s32.totalorder %s762_s7, %s810_s3 }
  0xfa   : > { %p542_p13 = scmp.lt.s32.totalorder %s540_s29, %s536_s17 }
  0xfb   : > { %p538_p11 = pnand %p537_p4, %p827_p1 }
  0xfc   : > { %p543_p3 = por %p542_p13, %p541_p6 }
  0xfd   : > { %p539_p5 = pneg %p538_p11 }
  0xff   : > { %p544_p12 = pnand %p543_p3, %p539_p5 }
 0x101   : > { %547 = shalt.err (!%p544_p12)
}
 0x102   : > { %s597_s26 = smov 256   ;;  %s598_s4 = smov 16  }
 0x103   : > { %409 = dma.vmem_to_hbm [thread:$0]  (%p827_p1), %s764_s20, 512, %s762_s7, %s284_s16, %s597_s26, %s597_s26, %s598_s4  }
 0x104 PF: > { %s313_s11 = sand.u32 1, %s578_s12   ;;  %p828_p7 = scmp.ne.s32.totalorder %s818_s25, 0 }
 0x105   : > { %p829_p8 = scmp.ge.s32.totalorder %s590_s15, 2  ;;  %s314_s22 = scalar_lea.sflag [#allocation4], %s313_s11 }
 0x107   : > { %p420_p9 = pnand %p829_p8, %p828_p7 }
 0x109   : > { %p421_p10 = pneg %p420_p9 }
 0x10b   : > { %573 = dma.done.wait (%p421_p10), %s314_s22, 512  }
 0x10c   : > { %575 = vsyncadd (%p421_p10), %s314_s22, 4294966784  ;;  %p17_p2 = scmp.ge.s32.totalorder %s644_s18, 4   ;;  %s830_s12 = smov %s582_s13 }
 0x10d   : > { %s831_s13 = smov %s586_s14  ;;  %s832_s14 = smov %s656_s21 }
 0x10e   : > { %s833_s15 = smov %s644_s18  ;;  %19 = sbr.rel (!%p17_p2) target bundleno = 6 (0x6), region = 81 }
 0x113   :  { %319 = vsyncpa [#allocation3], 1 }
 0x114   :  { %321 = vsyncpa [#allocation3 + $0x1], 1 }
 0x115   :  { %322 = vsyncpa [#allocation6], 1 }
 0x116   :  { %323 = vsyncpa [#allocation4], 1 }
 0x117   :  { %325 = vsyncpa [#allocation4 + $0x1], 1 }

</bundles_post_ra>
